<compile_context>
chip_gen: v5e
topology: v5e:2x2
jax: 0.10.0
libtpu: 0.0.40
codegen_flags: <defaults>
</compile_context>

<pallas_src>
import numpy as np
import jax
import jax.numpy as jnp
from jax.experimental import pallas as pl
from jax.experimental.pallas import tpu as pltpu


def _round_up(x, m):
    return ((x + m - 1) // m) * m


def critic_kernel(x_ref, w1_ref, b1_ref, w2_ref, b2_ref, w3_ref, b3_ref, out_ref):
    """Fused 3-layer MLP on one batch tile:
    relu(x@W1+b1) -> relu(.@W2+b2) -> VPU row-dot with W3 row + b3."""
    x = x_ref[...]
    # Layers 1 & 2: MXU matmuls with f32 accumulation, bias + ReLU on the VPU.
    h1 = jnp.dot(x, w1_ref[...], preferred_element_type=jnp.float32) + b1_ref[...]
    h1 = jnp.maximum(h1, 0.0)
    h2 = jnp.dot(h1, w2_ref[...], preferred_element_type=jnp.float32) + b2_ref[...]
    h2 = jnp.maximum(h2, 0.0)
    # Layer 3 (N=1): an MXU pass would use <1% of the array and stall on the
    # result FIFO; do it as an elementwise multiply + lane reduction instead.
    v = jnp.sum(h2 * w3_ref[...], axis=-1, keepdims=True) + b3_ref[...]
    out_ref[...] = v.astype(out_ref.dtype)


def critic_forward(state, params, *, block_b=512):
    """state: [B, state_dim] f32 -> value: [B, 1] f32."""
    w1, b1, w2, b2, w3, b3 = params
    B, S = state.shape
    W = w1.shape[1]

    # W3 as a (1, W) row so layer 3 is a broadcasted multiply + lane reduce.
    w3_row = w3.reshape(1, W)

    # Batch tile: large enough to pipeline the state DMA against compute,
    # sublane-aligned (multiple of 8 for f32), capped for v7x VMEM headroom.
    tb = min(block_b, _round_up(B, 8))
    b_pad = _round_up(B, tb)
    if b_pad != B:
        state = jnp.pad(state, ((0, b_pad - B), (0, 0)))
    n_blocks = b_pad // tb

    def resident(a):
        # Full-array block, same block every grid step -> stays in VMEM.
        return pl.BlockSpec(a.shape, lambda i: (0,) * a.ndim)

    flops = 2 * B * (S * W + W * W + W) + 2 * B * W  # matmuls + reduce + relus
    bytes_accessed = (
        b_pad * S * 4                # state stream in
        + b_pad * 4                  # values out
        + (w1.size + b1.size + w2.size + b2.size + w3.size + b3.size) * 4
    )

    out = pl.pallas_call(
        critic_kernel,
        out_shape=jax.ShapeDtypeStruct((b_pad, 1), jnp.float32),
        grid=(n_blocks,),
        in_specs=[
            pl.BlockSpec((tb, S), lambda i: (i, 0)),  # state: streamed per tile
            resident(w1), resident(b1),
            resident(w2), resident(b2),
            resident(w3_row), resident(b3),
        ],
        # TODO(synk): if store stalls ever show in a trace, emit a lane-dense
        # (n_blocks, TB) output slab and reshape in the wrapper instead.
        out_specs=pl.BlockSpec((tb, 1), lambda i: (i, 0)),
        compiler_params=pltpu.CompilerParams(
            dimension_semantics=("parallel",),
        ),
        cost_estimate=pl.CostEstimate(
            flops=flops, transcendentals=0, bytes_accessed=bytes_accessed
        ),
    )(state, w1, b1, w2, b2, w3_row, b3)

    return out[:B]


def init_critic_params(key, state_dim, net_width):
    """Deterministic init mimicking PyTorch nn.Linear default (uniform +-1/sqrt(fan_in))."""
    ks = jax.random.split(key, 6)

    def linear(kw, kb, fan_in, fan_out):
        bound = 1.0 / np.sqrt(fan_in)
        w = jax.random.uniform(kw, (fan_in, fan_out), jnp.float32, -bound, bound)
        b = jax.random.uniform(kb, (1, fan_out), jnp.float32, -bound, bound)
        return w, b

    w1, b1 = linear(ks[0], ks[1], state_dim, net_width)
    w2, b2 = linear(ks[2], ks[3], net_width, net_width)
    w3, b3 = linear(ks[4], ks[5], net_width, 1)
    return (w1, b1, w2, b2, w3, b3)


def critic_reference(state, params):
    w1, b1, w2, b2, w3, b3 = params
    h1 = jnp.maximum(state @ w1 + b1, 0.0)
    h2 = jnp.maximum(h1 @ w2 + b2, 0.0)
    return h2 @ w3 + b3


if __name__ == "__main__":
    # Small shapes consistent with the module's forward: batch=8, state_dim=16, net_width=32.
    B, STATE_DIM, NET_WIDTH = 8, 16, 32

    key = jax.random.PRNGKey(0)
    k_params, k_state, k_big = jax.random.split(key, 3)

    params = init_critic_params(k_params, STATE_DIM, NET_WIDTH)
    state = jax.random.normal(k_state, (B, STATE_DIM), jnp.float32)

    out = critic_forward(state, params)
    out = jax.block_until_ready(out)

    ref = critic_reference(state, params)
    np.testing.assert_allclose(np.asarray(out), np.asarray(ref), rtol=1e-5, atol=1e-5)
    assert out.shape == (B, 1)

    # Also exercise the gridded / padded batch path (multiple tiles + padding).
    BIG_B = 600
    big_state = jax.random.normal(k_big, (BIG_B, STATE_DIM), jnp.float32)
    big_out = jax.block_until_ready(critic_forward(big_state, params))
    big_ref = critic_reference(big_state, params)
    np.testing.assert_allclose(np.asarray(big_out), np.asarray(big_ref),
                               rtol=1e-5, atol=1e-5)
    assert big_out.shape == (BIG_B, 1)

    print("KERNEL_OK")
</pallas_src>

<mosaic_0001>
module attributes {stable_mosaic.version = 11 : i64} {
  func.func @critic_kernel(%arg0: i32, %arg1: memref<8x16xf32, #tpu.memory_space<vmem>>, %arg2: memref<16x32xf32, #tpu.memory_space<vmem>>, %arg3: memref<1x32xf32, #tpu.memory_space<vmem>>, %arg4: memref<32x32xf32, #tpu.memory_space<vmem>>, %arg5: memref<1x32xf32, #tpu.memory_space<vmem>>, %arg6: memref<1x32xf32, #tpu.memory_space<vmem>>, %arg7: memref<1x1xf32, #tpu.memory_space<vmem>>, %arg8: memref<8x1xf32, #tpu.memory_space<vmem>>) attributes {dimension_semantics = [#tpu.dimension_semantics<parallel>], iteration_bounds = array<i64: 1>, scalar_prefetch = 0 : i64, scratch_operands = 0 : i64, tpu.core_type = #tpu.core_type<tc>, window_params = [{transform_indices = @transform_0, window_bounds = array<i64: 8, 16>}, {pipeline_mode = #tpu.pipeline_mode<synchronous>, transform_indices = @transform_1, window_bounds = array<i64: 16, 32>}, {pipeline_mode = #tpu.pipeline_mode<synchronous>, transform_indices = @transform_2, window_bounds = array<i64: 1, 32>}, {pipeline_mode = #tpu.pipeline_mode<synchronous>, transform_indices = @transform_3, window_bounds = array<i64: 32, 32>}, {pipeline_mode = #tpu.pipeline_mode<synchronous>, transform_indices = @transform_4, window_bounds = array<i64: 1, 32>}, {pipeline_mode = #tpu.pipeline_mode<synchronous>, transform_indices = @transform_5, window_bounds = array<i64: 1, 32>}, {pipeline_mode = #tpu.pipeline_mode<synchronous>, transform_indices = @transform_6, window_bounds = array<i64: 1, 1>}, {transform_indices = @transform_7, window_bounds = array<i64: 8, 1>}]} {
    %c0 = arith.constant 0 : index
    %c0_0 = arith.constant 0 : index
    %0 = vector.load %arg1[%c0, %c0_0] : memref<8x16xf32, #tpu.memory_space<vmem>>, vector<8x16xf32>
    %c0_1 = arith.constant 0 : index
    %c0_2 = arith.constant 0 : index
    %1 = vector.load %arg2[%c0_1, %c0_2] : memref<16x32xf32, #tpu.memory_space<vmem>>, vector<16x32xf32>
    %cst = arith.constant dense<0.000000e+00> : vector<8x32xf32>
    %2 = tpu.matmul %0, %1, %cst {dimension_numbers = #tpu.dot_dimension_numbers<[1], [0], [0], [1], [0, 0, 1, 1], [], []>} : vector<8x16xf32>, vector<16x32xf32>, vector<8x32xf32> -> vector<8x32xf32>
    %c0_3 = arith.constant 0 : index
    %c0_4 = arith.constant 0 : index
    %3 = vector.load %arg3[%c0_3, %c0_4] : memref<1x32xf32, #tpu.memory_space<vmem>>, vector<1x32xf32>
    %4 = vector.broadcast %3 : vector<1x32xf32> to vector<8x32xf32>
    %5 = arith.addf %2, %4 : vector<8x32xf32>
    %cst_5 = arith.constant 0.000000e+00 : f32
    %6 = vector.broadcast %cst_5 : f32 to vector<8x32xf32>
    %7 = arith.maximumf %5, %6 : vector<8x32xf32>
    %c0_6 = arith.constant 0 : index
    %c0_7 = arith.constant 0 : index
    %8 = vector.load %arg4[%c0_6, %c0_7] : memref<32x32xf32, #tpu.memory_space<vmem>>, vector<32x32xf32>
    %cst_8 = arith.constant dense<0.000000e+00> : vector<8x32xf32>
    %9 = tpu.matmul %7, %8, %cst_8 {dimension_numbers = #tpu.dot_dimension_numbers<[1], [0], [0], [1], [0, 0, 1, 1], [], []>} : vector<8x32xf32>, vector<32x32xf32>, vector<8x32xf32> -> vector<8x32xf32>
    %c0_9 = arith.constant 0 : index
    %c0_10 = arith.constant 0 : index
    %10 = vector.load %arg5[%c0_9, %c0_10] : memref<1x32xf32, #tpu.memory_space<vmem>>, vector<1x32xf32>
    %11 = vector.broadcast %10 : vector<1x32xf32> to vector<8x32xf32>
    %12 = arith.addf %9, %11 : vector<8x32xf32>
    %cst_11 = arith.constant 0.000000e+00 : f32
    %13 = vector.broadcast %cst_11 : f32 to vector<8x32xf32>
    %14 = arith.maximumf %12, %13 : vector<8x32xf32>
    %c0_12 = arith.constant 0 : index
    %c0_13 = arith.constant 0 : index
    %15 = vector.load %arg6[%c0_12, %c0_13] : memref<1x32xf32, #tpu.memory_space<vmem>>, vector<1x32xf32>
    %16 = vector.broadcast %15 : vector<1x32xf32> to vector<8x32xf32>
    %17 = arith.mulf %14, %16 : vector<8x32xf32>
    %cst_14 = arith.constant dense<0.000000e+00> : vector<8xf32>
    %18 = vector.multi_reduction <add>, %17, %cst_14 [1] : vector<8x32xf32> to vector<8xf32>
    %19 = vector.shape_cast %18 : vector<8xf32> to vector<8x1xf32>
    %c0_15 = arith.constant 0 : index
    %c0_16 = arith.constant 0 : index
    %20 = vector.load %arg7[%c0_15, %c0_16] : memref<1x1xf32, #tpu.memory_space<vmem>>, vector<1x1xf32>
    %21 = vector.broadcast %20 : vector<1x1xf32> to vector<8x1xf32>
    %22 = arith.addf %19, %21 : vector<8x1xf32>
    %c0_17 = arith.constant 0 : index
    %c0_18 = arith.constant 0 : index
    %23 = vector.load %arg8[%c0_17, %c0_18] : memref<8x1xf32, #tpu.memory_space<vmem>>, vector<8x1xf32>
    tpu.vector_store %arg8[%c0_17, %c0_18], %22 {strides = array<i32>} : memref<8x1xf32, #tpu.memory_space<vmem>>, vector<8x1xf32>,
    return
  }
  func.func @transform_0(%arg0: i32) -> (i32, i32) {
    %c0_i32 = arith.constant 0 : i32
    %c0_i32_0 = arith.constant 0 : i32
    return %arg0, %c0_i32 : i32, i32
  }
  func.func @transform_1(%arg0: i32) -> (i32, i32) {
    %c0_i32 = arith.constant 0 : i32
    %c0_i32_0 = arith.constant 0 : i32
    %c0_i32_1 = arith.constant 0 : i32
    return %c0_i32, %c0_i32_0 : i32, i32
  }
  func.func @transform_2(%arg0: i32) -> (i32, i32) {
    %c0_i32 = arith.constant 0 : i32
    %c0_i32_0 = arith.constant 0 : i32
    %c0_i32_1 = arith.constant 0 : i32
    return %c0_i32, %c0_i32_0 : i32, i32
  }
  func.func @transform_3(%arg0: i32) -> (i32, i32) {
    %c0_i32 = arith.constant 0 : i32
    %c0_i32_0 = arith.constant 0 : i32
    %c0_i32_1 = arith.constant 0 : i32
    return %c0_i32, %c0_i32_0 : i32, i32
  }
  func.func @transform_4(%arg0: i32) -> (i32, i32) {
    %c0_i32 = arith.constant 0 : i32
    %c0_i32_0 = arith.constant 0 : i32
    %c0_i32_1 = arith.constant 0 : i32
    return %c0_i32, %c0_i32_0 : i32, i32
  }
  func.func @transform_5(%arg0: i32) -> (i32, i32) {
    %c0_i32 = arith.constant 0 : i32
    %c0_i32_0 = arith.constant 0 : i32
    %c0_i32_1 = arith.constant 0 : i32
    return %c0_i32, %c0_i32_0 : i32, i32
  }
  func.func @transform_6(%arg0: i32) -> (i32, i32) {
    %c0_i32 = arith.constant 0 : i32
    %c0_i32_0 = arith.constant 0 : i32
    %c0_i32_1 = arith.constant 0 : i32
    return %c0_i32, %c0_i32_0 : i32, i32
  }
  func.func @transform_7(%arg0: i32) -> (i32, i32) {
    %c0_i32 = arith.constant 0 : i32
    %c0_i32_0 = arith.constant 0 : i32
    return %arg0, %c0_i32 : i32, i32
  }
}

</mosaic_0001>

<bundles_post_ra>
// kernel: tpu_custom_call.1
= control target key start
LH: loop header
LB: loop body
LE: loop exit
PB: predicated region body
PF: predicated region fallthrough
CT: control target
= control target key end

     0   :  { %s315_s0 = inlined_call_operand.hbm [shape: f32[8,16], index: 0, kind: input, shape index: {}]   ;;  %s316_s1 = inlined_call_operand.hbm [shape: f32[16,32], index: 1, kind: input, shape index: {}]   ;;  %s317_s2 = inlined_call_operand.vmem [shape: f32[1,32], index: 2, kind: input, shape index: {}]   ;;  %s318_s3 = inlined_call_operand.hbm [shape: f32[32,32], index: 3, kind: input, shape index: {}]   ;;  %s319_s4 = inlined_call_operand.vmem [shape: f32[1,32], index: 4, kind: input, shape index: {}]   ;;  %s320_s5 = inlined_call_operand.vmem [shape: f32[1,32], index: 5, kind: input, shape index: {}]   ;;  %s321_s6 = inlined_call_operand.<no memory space> [shape: f32[1,1], index: 6, kind: input, shape index: {}]   ;;  %s322_s7 = inlined_call_operand.vmem [shape: f32[8,1], index: 7, kind: output, shape index: {}]  }
   0x1   :  { %v12_v0 = vstv %s321_s6 }
   0x2   :  { %13 = vst [vmem:[#allocation2] sm:$0x1] %v12_v0 }
   0x3   :  { %14 = vsyncpa [#allocation4], 0 }
   0x4   :  { %15 = vsyncpa [#allocation6], 0  ;;  %s31_s28 = sshll.u32 %s316_s1, 4  ;;  %s246_s29 = smov [#allocation5]   ;;  %s32_s28 = int_to_ptr.hbm [resolvable:$true] %s31_s28 }
   0x5   :  { %s33_s30 = sshll.u32 %s246_s29, 4  ;;  %s21_s10 = sshll.u32 %s315_s0, 4  ;;  %s34_s30 = int_to_ptr.vmem [resolvable:$true] %s33_s30  ;;  %s22_s10 = int_to_ptr.hbm [resolvable:$true] %s21_s10 }
   0x6   :  { %s247_s11 = smov 128   ;;  %s248_s12 = smov 8  }
   0x7   :  { %39 = dma.hbm_to_vmem [thread:$0]  %s32_s28, 256, %s34_s30, [#allocation6], %s247_s11, %s247_s11, %s248_s12  }
   0x8   :  { %s249_s6 = smov [#allocation3]   ;;  %s46_s16 = sshll.u32 %s318_s3, 4  ;;  %s47_s16 = int_to_ptr.hbm [resolvable:$true] %s46_s16 }
   0x9   :  { %s23_s13 = sshll.u32 %s249_s6, 4  ;;  %s250_s1 = smov [#allocation7]   ;;  %s24_s13 = int_to_ptr.vmem [resolvable:$true] %s23_s13 }
   0xa   :  { %26 = dma.hbm_to_vmem [thread:$0]  %s22_s10, 128, %s24_s13, [#allocation4]  }
   0xb   :  { %s48_s17 = sshll.u32 %s250_s1, 4  ;;  %s49_s17 = int_to_ptr.vmem [resolvable:$true] %s48_s17 }
   0xc   :  { %54 = dma.hbm_to_vmem [thread:$0]  %s47_s16, 512, %s49_s17, [#allocation6], %s247_s11, %s247_s11, %s248_s12  }
   0xd   :  { %242 = dma.done.wait [#allocation4], 128  }
   0xe   :  { %243 = vsyncadd [#allocation4], 4294967168 }
   0xf   :  { %244 = dma.done.wait [#allocation6], 768  }
  0x10   :  { %245 = vsyncadd [#allocation6], 4294966528  ;;  %v75_v1 = vld [vmem:[#allocation5 + $0x8] sm:$0xff]  ;;  %v74_v2 = vld [vmem:[#allocation5] sm:$0xff]  ;;  %vm80_vm0 = vcmask 130048   ;;  %vm113_vm1 = vcmask 261120  }
  0x11   :  { %98 = vmatpush.msra.mxu0 %v75_v1  ;;  %v73_v3 = vld [vmem:[#allocation3] sm:$0xff]  ;;  %v108_v4 = vld [vmem:[#allocation7 + $0x18] sm:$0xff]  ;;  %v107_v5 = vld [vmem:[#allocation7 + $0x10] sm:$0xff]  ;;  %vm151_vm2 = vcmask 7168  }
  0x12   :  { %129 = vmatpush.msra.mxu1 %v108_v4  ;;  %v106_v6 = vld [vmem:[#allocation7 + $0x8] sm:$0xff]  ;;  %v105_v7 = vld [vmem:[#allocation7] sm:$0xff] }
  0x13   :  { %99 = vmatpush.msra.mxu0 %v74_v2  ;;  %v166_v8 = vld [vmem:[%s317_s2] ss:$0 sm:$0xff] }
  0x14   :  { %159 = vmatmul.msk.f32.vlgmr.msra.gmra.mxu0 %vm80_vm0, %v73_v3  ;;  %130 = vmatpush.msra.mxu1 %v107_v5  ;;  %v167_v12 = vld [vmem:[%s319_s4] ss:$0 sm:$0xff] }
  0x15   :  { %v168_v15 = vld [vmem:[%s320_s5] ss:$0 sm:$0xff] }
  0x16   :  { %131 = vmatpush.msra.mxu1 %v106_v6  ;;  %v169_v19 = vld [vmem:[#allocation2] ss:$0 sm:$0xff] }
  0x18   :  { %132 = vmatpush.msra.mxu1 %v105_v7 }
  0x91   :  { %v101_v9 = vpop.f32.mrf.mxu0 }
  0x92   :  { %v102_v10 = vadd.f32 %v166_v8, %v101_v9 }
  0x94   :  { %v104_v11 = vmax.f32 %v102_v10, 0.0 }
  0x96   :  { %160 = vmatmul.msk.f32.vlgmr.msra.gmra.mxu1 %vm113_vm1, %v104_v11 }
 0x113   :  { %v134_v13 = vpop.f32.mrf.mxu1 }
 0x114   :  { %v135_v14 = vadd.f32 %v167_v12, %v134_v13 }
 0x116   :  { %v137_v16 = vmax.f32 %v135_v14, 0.0 }
 0x118   :  { %v142_v17 = vmul.f32 %v168_v15, %v137_v16 }
 0x11a   :  { %v143_v18 = vsel %vm113_vm1, %v142_v17, 0.0 }
 0x11b   :  { %144 = vadd.xlane.f32.xlu0 %v143_v18 }
 0x18e   :  { %v145_v20 = vpop.xlane.xlu0 %144 }
 0x18f   :  { %v150_v21 = vadd.f32 %v169_v19, %v145_v20 }
 0x191   :  { %152 = vst.msk [vmem:[%s322_s7] sm:$0xff] %vm151_vm2, %v150_v21 }
 0x192   :  { %157 = vsyncpa [#allocation4], 1 }
 0x193   :  { %158 = vsyncpa [#allocation6], 1 }

</bundles_post_ra>
